<compile_context>
chip_gen: v7x
topology: tpu7x:2x2x1
jax: 0.10.0
libtpu: 0.0.40
codegen_flags: <defaults>
</compile_context>

<pallas_src>
import jax
import jax.numpy as jnp
from jax.experimental import pallas as pl
from jax.experimental.pallas import tpu as pltpu


def _hard_sigmoid_kernel(x_ref, o_ref):
    x = x_ref[...]
    # (clamp(x,-2.5,2.5)+2.5)/5  ==  (clamp(x,-2.5,2.5)+2.5)*0.2
    o_ref[...] = ((jnp.clip(x, -2.5, 2.5) + 2.5) * 0.2).astype(o_ref.dtype)


_LANE_CANDIDATES = (4096, 2048, 1024, 512, 256, 128)


def hard_sigmoid(x, *, target_block_bytes=2 * 1024 * 1024, alias_input=True):
    """Elementwise hard sigmoid via a Pallas TPU kernel.

    Flattens to a lane-dense 2-D slab (last dim a wide multiple of 128),
    avoids padding whenever the element count allows it, and runs ~2 MiB
    blocks over a 1-D parallel grid.
    """
    orig_shape = x.shape
    dtype = x.dtype
    n = x.size
    if n == 0:
        return x
    itemsize = jnp.dtype(dtype).itemsize

    # Widest lane width that divides n -> no padding needed (common LiGRU case).
    lanes = None
    for cand in _LANE_CANDIDATES:
        if n % cand == 0:
            lanes = cand
            break

    x_flat = jnp.reshape(x, (-1,))
    if lanes is None:
        # Ragged size: pad minimally to a multiple of 8*128 elements.
        pad_to = 8 * 128
        n_pad = pl.cdiv(n, pad_to) * pad_to
        x_flat = jnp.pad(x_flat, (0, n_pad - n))
        for cand in _LANE_CANDIDATES:
            if n_pad % cand == 0:
                lanes = cand
                break
    else:
        n_pad = n

    rows = n_pad // lanes
    x2d = jnp.reshape(x_flat, (rows, lanes))

    # Sublane multiple for the dtype (f32: 8, bf16: 16, int8/fp8: 32).
    sub = max(8, 32 // max(1, itemsize))
    block_rows = max(sub, (target_block_bytes // (lanes * itemsize)) // sub * sub)
    if rows <= block_rows:
        block_rows = rows  # full sublane extent is always a legal block
    grid = (pl.cdiv(rows, block_rows),)

    extra_kwargs = {}
    if alias_input:
        # Output reuses the input HBM buffer when the input is dead afterwards
        # (XLA inserts a defensive copy otherwise, so this is always safe).
        extra_kwargs["input_output_aliases"] = {0: 0}

    out2d = pl.pallas_call(
        _hard_sigmoid_kernel,
        out_shape=jax.ShapeDtypeStruct((rows, lanes), dtype),
        grid_spec=pltpu.PrefetchScalarGridSpec(
            num_scalar_prefetch=0,
            grid=grid,
            in_specs=[pl.BlockSpec((block_rows, lanes), lambda i: (i, 0))],
            out_specs=pl.BlockSpec((block_rows, lanes), lambda i: (i, 0)),
        ),
        compiler_params=pltpu.CompilerParams(
            dimension_semantics=("parallel",)
        ),
        **extra_kwargs,
    )(x2d)

    if n_pad != n:
        return jnp.reshape(jnp.reshape(out2d, (-1,))[:n], orig_shape)
    return jnp.reshape(out2d, orig_shape)


if __name__ == "__main__":
    key = jax.random.PRNGKey(0)

    # LiGRU-style gate pre-activation shape: (batch, seq, hidden).
    B, T, H = 2, 8, 32
    x = jax.random.normal(key, (B, T, H), dtype=jnp.float32) * 4.0
    # Reference (module semantics), computed before the kernel call.
    y_ref = (jnp.clip(x, -2.5, 2.5) + 2.5) / 5.0

    y = jax.block_until_ready(hard_sigmoid(x))
    assert y.shape == x.shape and y.dtype == x.dtype
    assert jnp.max(jnp.abs(y - y_ref)) < 1e-5

    # Ragged-size input exercises the minimal-padding fallback path.
    x2 = jax.random.normal(jax.random.PRNGKey(1), (3, 7, 5), dtype=jnp.float32) * 4.0
    y2_ref = (jnp.clip(x2, -2.5, 2.5) + 2.5) / 5.0
    y2 = jax.block_until_ready(hard_sigmoid(x2))
    assert y2.shape == x2.shape and y2.dtype == x2.dtype
    assert jnp.max(jnp.abs(y2 - y2_ref)) < 1e-5

    print("KERNEL_OK")
</pallas_src>

<mosaic_0001>
module attributes {stable_mosaic.version = 11 : i64} {
  func.func @_hard_sigmoid_kernel(%arg0: i32, %arg1: memref<1x512xf32, #tpu.memory_space<vmem>>, %arg2: memref<1x512xf32, #tpu.memory_space<vmem>>) attributes {dimension_semantics = [#tpu.dimension_semantics<parallel>], iteration_bounds = array<i64: 1>, scalar_prefetch = 0 : i64, scratch_operands = 0 : i64, tpu.core_type = #tpu.core_type<tc>, window_params = [{transform_indices = @transform_0, window_bounds = array<i64: 1, 512>}, {transform_indices = @transform_1, window_bounds = array<i64: 1, 512>}]} {
    %c0 = arith.constant 0 : index
    %c0_0 = arith.constant 0 : index
    %0 = vector.load %arg1[%c0, %c0_0] : memref<1x512xf32, #tpu.memory_space<vmem>>, vector<1x512xf32>
    %cst = arith.constant -2.500000e+00 : f32
    %cst_1 = arith.constant 2.500000e+00 : f32
    %1 = vector.broadcast %cst : f32 to vector<1x512xf32>
    %2 = arith.maximumf %1, %0 : vector<1x512xf32>
    %3 = vector.broadcast %cst_1 : f32 to vector<1x512xf32>
    %4 = arith.minimumf %3, %2 : vector<1x512xf32>
    %cst_2 = arith.constant 2.500000e+00 : f32
    %5 = vector.broadcast %cst_2 : f32 to vector<1x512xf32>
    %6 = arith.addf %4, %5 : vector<1x512xf32>
    %cst_3 = arith.constant 2.000000e-01 : f32
    %7 = vector.broadcast %cst_3 : f32 to vector<1x512xf32>
    %8 = arith.mulf %6, %7 : vector<1x512xf32>
    %c0_4 = arith.constant 0 : index
    %c0_5 = arith.constant 0 : index
    %9 = vector.load %arg2[%c0_4, %c0_5] : memref<1x512xf32, #tpu.memory_space<vmem>>, vector<1x512xf32>
    tpu.vector_store %arg2[%c0_4, %c0_5], %8 {strides = array<i32>} : memref<1x512xf32, #tpu.memory_space<vmem>>, vector<1x512xf32>,
    return
  }
  func.func @transform_0(%arg0: i32) -> (i32, i32) {
    %c0_i32 = arith.constant 0 : i32
    %c0_i32_0 = arith.constant 0 : i32
    return %arg0, %c0_i32 : i32, i32
  }
  func.func @transform_1(%arg0: i32) -> (i32, i32) {
    %c0_i32 = arith.constant 0 : i32
    %c0_i32_0 = arith.constant 0 : i32
    return %arg0, %c0_i32 : i32, i32
  }
}

</mosaic_0001>

<bundles_post_ra>
// kernel: tpu_custom_call.1
= control target key start
LH: loop header
LB: loop body
LE: loop exit
PB: predicated region body
PF: predicated region fallthrough
CT: control target
= control target key end

     0   :  { %6 = vsyncpa [#allocation3], 0  ;;  %s133_s0 = inlined_call_operand.hbm [shape: f32[1,512], index: 0, kind: input, shape index: {}, may-alias: {0,1}]   ;;  %s134_s1 = inlined_call_operand.hbm [shape: f32[1,512], index: 1, kind: output, shape index: {}, may-alias: {0,1}]  }
   0x1   :  { %7 = vsyncpa [#allocation4], 0  ;;  %s97_s6 = smov [#allocation2]   ;;  %s49_s10 = scalar_lea.hbm %s133_s0, 64 }
   0x2   :  { %s14_s7 = sshll.u32 %s97_s6, 4  ;;  %p50_p0 = scmp.ne.s32.totalorder %s133_s0, %s49_s10  ;;  %s15_s7 = int_to_ptr.vmem [resolvable:$true] %s14_s7 }
   0x3   :  { %p53_p1 = scmp.lt.u32.totalorder %s49_s10, %s133_s0 }
   0x5   :  { %p55_p2 = pnand %p53_p1, %p50_p0 }
   0x7   :  { %58 = shalt.err (!%p55_p2)
}
   0x8   :  { %s59_s15 = scalar_lea.vmem %s15_s7, 64  ;;  %p64_p4 = scmp.lt.s32.totalorder %s15_s7, %s15_s7 }
   0x9   :  { %p60_p3 = scmp.ne.s32.totalorder %s15_s7, %s59_s15  ;;  %p65_p5 = scmp.lt.s32.totalorder %s59_s15, %s59_s15 }
   0xb   :  { %p66_p6 = por %p65_p5, %p64_p4 }
   0xd   :  { %p67_p7 = pnand %p66_p6, %p60_p3 }
   0xf   :  { %70 = shalt.err (!%p67_p7)
}
  0x10   :  { %17 = dma.hbm_to_vmem [thread:$0]  %s133_s0, 64, %s15_s7, [#allocation3]  }
  0x11   :  { %93 = dma.done.wait [#allocation3], 64  }
  0x12   :  { %94 = vsyncadd [#allocation3], 4294967232  ;;  %v21_v0 = vld [vmem:[#allocation2] sm:$0xf]  ;;  %v26_v1 = vlaneseq  ;;  %s98_s18 = smov [#allocation5]  }
  0x13   :  { %v46_v2 = vclamps-f32 %v21_v0, 2.5  ;;  %s37_s19 = sshll.u32 %s98_s18, 4  ;;  %s38_s19 = int_to_ptr.vmem [resolvable:$true] %s37_s19 }
  0x14   :  { %vm28_vm0 = vcmp.lt.s32.totalorder %v26_v1, 512  ;;  %s71_s20 = scalar_lea.vmem %s38_s19, 64  ;;  %p76_p9 = scmp.lt.s32.totalorder %s38_s19, %s38_s19 }
  0x15   :  { %v24_v3 = vadd.f32 2.5, %v46_v2  ;;  %p72_p8 = scmp.ne.s32.totalorder %s38_s19, %s71_s20  ;;  %p77_p10 = scmp.lt.s32.totalorder %s71_s20, %s71_s20 }
  0x17   :  { %v25_v4 = vmul.f32 0.2, %v24_v3  ;;  %p78_p11 = por %p77_p10, %p76_p9 }
  0x19   :  { %30 = vst.msk [vmem:[#allocation5] sm:$0xf] %vm28_vm0, %v25_v4  ;;  %p79_p12 = pnand %p78_p11, %p72_p8 }
  0x1b   :  { %82 = shalt.err (!%p79_p12)
}
  0x1c   :  { %s83_s22 = scalar_lea.hbm %s134_s1, 64 }
  0x1d   :  { %p84_p13 = scmp.ne.s32.totalorder %s134_s1, %s83_s22  ;;  %p87_p0 = scmp.lt.u32.totalorder %s83_s22, %s134_s1 }
  0x1f   :  { %p89_p1 = pnand %p87_p0, %p84_p13 }
  0x21   :  { %92 = shalt.err (!%p89_p1)
}
  0x22   :  { %40 = dma.vmem_to_hbm [thread:$0]  %s38_s19, 64, %s134_s1, [#allocation4]  }
  0x23   :  { %95 = dma.done.wait [#allocation4], 64  }
  0x24   :  { %96 = vsyncadd [#allocation4], 4294967232 }
  0x25   :  { %44 = vsyncpa [#allocation3], 1 }
  0x26   :  { %45 = vsyncpa [#allocation4], 1 }

</bundles_post_ra>
